<compile_context>
chip_gen: v7x
topology: tpu7x:2x2x1
jax: 0.10.0
libtpu: 0.0.40
codegen_flags: <defaults>
</compile_context>

<pallas_src>
import jax
import jax.numpy as jnp
from jax.experimental import pallas as pl
from jax.experimental.pallas import tpu as pltpu


def _round_up(v, m):
    return ((v + m - 1) // m) * m


def _classifier_kernel(x_ref, w_big_ref, b_enc_ref, w_fc_ref, b_fc_ref, out_ref):
    # x_ref: [TB, C*H*W] f32.  The 1/(H*W) spatial-mean factor is already
    # folded into w_big, so pooling + encoder Linear is a single MXU matmul.
    x = x_ref[...].astype(jnp.bfloat16)                       # MXU-native dtype
    feat = jnp.dot(x, w_big_ref[...],
                   preferred_element_type=jnp.float32)        # [TB, 512] f32 acc
    feat = jnp.maximum(feat + b_enc_ref[...], 0.0)            # bias + ReLU (f32, VPU)

    # Head fc: Linear(512, 10), zero-padded to 128 output lanes (lane-dense store).
    out = jnp.dot(feat.astype(jnp.bfloat16), w_fc_ref[...],
                  preferred_element_type=jnp.float32) + b_fc_ref[...]   # [TB, 128]
    out_ref[...] = out.astype(out_ref.dtype)


def fine_tuned_classifier(x, w_enc, b_enc, w_fc, b_fc, *, tb_max=128):
    """x: [B, C, H, W] float32 -> logits [B, 10] float32."""
    B, C, H, W = x.shape
    HW = H * W
    K = C * HW
    F = w_enc.shape[1]            # 512
    NUM_CLASSES = w_fc.shape[1]   # 10
    N_PAD = _round_up(max(NUM_CLASSES, 128), 128)   # lane-dense output width

    # --- fold the spatial mean into the encoder weight (pool + linear fused) ---
    # w_big[c*HW + s, f] = w_enc[c, f] / HW  matches x.reshape(B, C*HW) layout.
    w_big = (jnp.repeat(w_enc.astype(jnp.float32), HW, axis=0) / HW).astype(jnp.bfloat16)

    # --- lane-dense padded fc weights (pad columns are zero) ---
    w_fc_p = jnp.zeros((F, N_PAD), jnp.bfloat16).at[:, :NUM_CLASSES].set(
        w_fc.astype(jnp.bfloat16))
    b_enc2 = b_enc.reshape(1, F).astype(jnp.float32)
    b_fc_p = jnp.zeros((1, N_PAD), jnp.float32).at[0, :NUM_CLASSES].set(
        b_fc.astype(jnp.float32))

    # --- batch tile: multiple of 8 sublanes, capped so the x tile stays well
    # within a double-buffered v7x (64 MiB) VMEM budget (~4 MiB per buffer) ---
    bytes_per_row = K * x.dtype.itemsize
    tb_cap = max(8, min(tb_max, (4 << 20) // max(bytes_per_row, 1)))
    tb_cap = max(8, (tb_cap // 8) * 8)
    tb = min(tb_cap, _round_up(B, 8))
    B_pad = _round_up(B, tb)

    x2d = x.reshape(B, K)
    if B_pad != B:
        x2d = jnp.pad(x2d, ((0, B_pad - B), (0, 0)))

    grid = (B_pad // tb,)

    out = pl.pallas_call(
        _classifier_kernel,
        out_shape=jax.ShapeDtypeStruct((B_pad, N_PAD), jnp.float32),
        grid=grid,
        in_specs=[
            pl.BlockSpec((tb, K), lambda i: (i, 0)),        # x tile (pipelined)
            pl.BlockSpec((K, F), lambda i: (0, 0)),         # fused encoder weight
            pl.BlockSpec((1, F), lambda i: (0, 0)),         # encoder bias
            pl.BlockSpec((F, N_PAD), lambda i: (0, 0)),     # fc weight (padded)
            pl.BlockSpec((1, N_PAD), lambda i: (0, 0)),     # fc bias (padded)
        ],
        out_specs=pl.BlockSpec((tb, N_PAD), lambda i: (i, 0)),
        compiler_params=pltpu.CompilerParams(
            dimension_semantics=("parallel",),              # shard batch across TCs
            vmem_limit_bytes=48 * 1024 * 1024,              # < 64 MiB v7x physical
        ),
    )(x2d, w_big, b_enc2, w_fc_p, b_fc_p)

    return out[:B, :NUM_CLASSES]


def _reference(x, w_enc, b_enc, w_fc, b_fc):
    pooled = jnp.mean(x.astype(jnp.float32), axis=(2, 3))
    feat = jnp.maximum(pooled @ w_enc + b_enc, 0.0)
    return feat @ w_fc + b_fc


if __name__ == "__main__":
    B, C, H, W = 2, 4, 16, 16
    FEAT, NUM_CLASSES = 512, 10

    key = jax.random.PRNGKey(0)
    kx, k1, k2, k3, k4 = jax.random.split(key, 5)

    x = jax.random.normal(kx, (B, C, H, W), dtype=jnp.float32)

    # Deterministic parameter init (synthetic; not loaded from a checkpoint).
    w_enc = jax.random.normal(k1, (C, FEAT), dtype=jnp.float32) * 0.05
    b_enc = jax.random.normal(k2, (FEAT,), dtype=jnp.float32) * 0.01
    w_fc = jax.random.normal(k3, (FEAT, NUM_CLASSES), dtype=jnp.float32) * 0.05
    b_fc = jax.random.normal(k4, (NUM_CLASSES,), dtype=jnp.float32) * 0.01

    out = fine_tuned_classifier(x, w_enc, b_enc, w_fc, b_fc)
    out = jax.block_until_ready(out)

    ref = _reference(x, w_enc, b_enc, w_fc, b_fc)
    assert out.shape == (B, NUM_CLASSES)
    # bf16 weights / bf16 matmul inputs with f32 accumulation -> small tolerance.
    assert jnp.allclose(out, ref, atol=1e-3, rtol=1e-2), "mismatch vs reference"

    print("KERNEL_OK")
</pallas_src>

<mosaic_0001>
module attributes {stable_mosaic.version = 11 : i64} {
  func.func @_classifier_kernel(%arg0: i32, %arg1: memref<8x1024xf32, #tpu.memory_space<vmem>>, %arg2: memref<1024x512xbf16, #tpu.memory_space<vmem>>, %arg3: memref<1x512xf32, #tpu.memory_space<vmem>>, %arg4: memref<512x128xbf16, #tpu.memory_space<vmem>>, %arg5: memref<1x128xf32, #tpu.memory_space<vmem>>, %arg6: memref<8x128xf32, #tpu.memory_space<vmem>>) attributes {dimension_semantics = [#tpu.dimension_semantics<parallel>], iteration_bounds = array<i64: 1>, scalar_prefetch = 0 : i64, scratch_operands = 0 : i64, tpu.core_type = #tpu.core_type<tc>, window_params = [{transform_indices = @transform_0, window_bounds = array<i64: 8, 1024>}, {pipeline_mode = #tpu.pipeline_mode<synchronous>, transform_indices = @transform_1, window_bounds = array<i64: 1024, 512>}, {pipeline_mode = #tpu.pipeline_mode<synchronous>, transform_indices = @transform_2, window_bounds = array<i64: 1, 512>}, {pipeline_mode = #tpu.pipeline_mode<synchronous>, transform_indices = @transform_3, window_bounds = array<i64: 512, 128>}, {pipeline_mode = #tpu.pipeline_mode<synchronous>, transform_indices = @transform_4, window_bounds = array<i64: 1, 128>}, {transform_indices = @transform_5, window_bounds = array<i64: 8, 128>}]} {
    %c0 = arith.constant 0 : index
    %c0_0 = arith.constant 0 : index
    %0 = vector.load %arg1[%c0, %c0_0] : memref<8x1024xf32, #tpu.memory_space<vmem>>, vector<8x1024xf32>
    %1 = arith.truncf %0 : vector<8x1024xf32> to vector<8x1024xbf16>
    %c0_1 = arith.constant 0 : index
    %c0_2 = arith.constant 0 : index
    %2 = vector.load %arg2[%c0_1, %c0_2] : memref<1024x512xbf16, #tpu.memory_space<vmem>>, vector<1024x512xbf16>
    %cst = arith.constant dense<0.000000e+00> : vector<8x512xf32>
    %3 = tpu.matmul %1, %2, %cst {dimension_numbers = #tpu.dot_dimension_numbers<[1], [0], [0], [1], [0, 0, 1, 1], [], []>} : vector<8x1024xbf16>, vector<1024x512xbf16>, vector<8x512xf32> -> vector<8x512xf32>
    %c0_3 = arith.constant 0 : index
    %c0_4 = arith.constant 0 : index
    %4 = vector.load %arg3[%c0_3, %c0_4] : memref<1x512xf32, #tpu.memory_space<vmem>>, vector<1x512xf32>
    %5 = vector.broadcast %4 : vector<1x512xf32> to vector<8x512xf32>
    %6 = arith.addf %3, %5 : vector<8x512xf32>
    %cst_5 = arith.constant 0.000000e+00 : f32
    %7 = vector.broadcast %cst_5 : f32 to vector<8x512xf32>
    %8 = arith.maximumf %6, %7 : vector<8x512xf32>
    %9 = arith.truncf %8 : vector<8x512xf32> to vector<8x512xbf16>
    %c0_6 = arith.constant 0 : index
    %c0_7 = arith.constant 0 : index
    %10 = vector.load %arg4[%c0_6, %c0_7] : memref<512x128xbf16, #tpu.memory_space<vmem>>, vector<512x128xbf16>
    %cst_8 = arith.constant dense<0.000000e+00> : vector<8x128xf32>
    %11 = tpu.matmul %9, %10, %cst_8 {dimension_numbers = #tpu.dot_dimension_numbers<[1], [0], [0], [1], [0, 0, 1, 1], [], []>} : vector<8x512xbf16>, vector<512x128xbf16>, vector<8x128xf32> -> vector<8x128xf32>
    %c0_9 = arith.constant 0 : index
    %c0_10 = arith.constant 0 : index
    %12 = vector.load %arg5[%c0_9, %c0_10] : memref<1x128xf32, #tpu.memory_space<vmem>>, vector<1x128xf32>
    %13 = vector.broadcast %12 : vector<1x128xf32> to vector<8x128xf32>
    %14 = arith.addf %11, %13 : vector<8x128xf32>
    %c0_11 = arith.constant 0 : index
    %c0_12 = arith.constant 0 : index
    %15 = vector.load %arg6[%c0_11, %c0_12] : memref<8x128xf32, #tpu.memory_space<vmem>>, vector<8x128xf32>
    tpu.vector_store %arg6[%c0_11, %c0_12], %14 {strides = array<i32>} : memref<8x128xf32, #tpu.memory_space<vmem>>, vector<8x128xf32>,
    return
  }
  func.func @transform_0(%arg0: i32) -> (i32, i32) {
    %c0_i32 = arith.constant 0 : i32
    %c0_i32_0 = arith.constant 0 : i32
    return %arg0, %c0_i32 : i32, i32
  }
  func.func @transform_1(%arg0: i32) -> (i32, i32) {
    %c0_i32 = arith.constant 0 : i32
    %c0_i32_0 = arith.constant 0 : i32
    %c0_i32_1 = arith.constant 0 : i32
    return %c0_i32, %c0_i32_0 : i32, i32
  }
  func.func @transform_2(%arg0: i32) -> (i32, i32) {
    %c0_i32 = arith.constant 0 : i32
    %c0_i32_0 = arith.constant 0 : i32
    %c0_i32_1 = arith.constant 0 : i32
    return %c0_i32, %c0_i32_0 : i32, i32
  }
  func.func @transform_3(%arg0: i32) -> (i32, i32) {
    %c0_i32 = arith.constant 0 : i32
    %c0_i32_0 = arith.constant 0 : i32
    %c0_i32_1 = arith.constant 0 : i32
    return %c0_i32, %c0_i32_0 : i32, i32
  }
  func.func @transform_4(%arg0: i32) -> (i32, i32) {
    %c0_i32 = arith.constant 0 : i32
    %c0_i32_0 = arith.constant 0 : i32
    %c0_i32_1 = arith.constant 0 : i32
    return %c0_i32, %c0_i32_0 : i32, i32
  }
  func.func @transform_5(%arg0: i32) -> (i32, i32) {
    %c0_i32 = arith.constant 0 : i32
    %c0_i32_0 = arith.constant 0 : i32
    return %arg0, %c0_i32 : i32, i32
  }
}

</mosaic_0001>

<bundles_post_ra>
// kernel: tpu_custom_call.1
= control target key start
LH: loop header
LB: loop body
LE: loop exit
PB: predicated region body
PF: predicated region fallthrough
CT: control target
= control target key end

     0   :  { %10 = vsyncpa [#allocation3], 0  ;;  %s3302_s0 = inlined_call_operand.hbm [shape: f32[8,1024], index: 0, kind: input, shape index: {}]   ;;  %s3303_s1 = inlined_call_operand.hbm [shape: bf16[1024,512], index: 1, kind: input, shape index: {}]   ;;  %s3304_s2 = inlined_call_operand.vmem [shape: f32[1,512], index: 2, kind: input, shape index: {}]   ;;  %s3305_s3 = inlined_call_operand.hbm [shape: bf16[512,128], index: 3, kind: input, shape index: {}]   ;;  %s3306_s4 = inlined_call_operand.vmem [shape: f32[1,128], index: 4, kind: input, shape index: {}]   ;;  %s3307_s5 = inlined_call_operand.hbm [shape: f32[8,128], index: 5, kind: output, shape index: {}]  }
   0x1   :  { %11 = vsyncpa [#allocation6], 0 }
   0x2   :  { %12 = vsyncpa [#allocation4], 0  ;;  %s3210_s18 = smov [#allocation5]   ;;  %s3116_s22 = scalar_lea.hbm %s3303_s1, 32768 }
   0x3   :  { %s28_s19 = sshll.u32 %s3210_s18, 4  ;;  %p3117_p0 = scmp.ne.s32.totalorder %s3303_s1, %s3116_s22  ;;  %s29_s19 = int_to_ptr.vmem [resolvable:$true] %s28_s19 }
   0x4   :  { %p3120_p1 = scmp.lt.u32.totalorder %s3116_s22, %s3303_s1 }
   0x6   :  { %p3122_p2 = pnand %p3120_p1, %p3117_p0 }
   0x8   :  { %3125 = shalt.err (!%p3122_p2)
}
   0x9   :  { %s3126_s27 = scalar_lea.vmem %s29_s19, 32768  ;;  %p3131_p4 = scmp.lt.s32.totalorder %s29_s19, %s29_s19 }
   0xa   :  { %p3127_p3 = scmp.ne.s32.totalorder %s29_s19, %s3126_s27  ;;  %p3132_p5 = scmp.lt.s32.totalorder %s3126_s27, %s3126_s27 }
   0xc   :  { %p3133_p6 = por %p3132_p5, %p3131_p4 }
   0xe   :  { %p3134_p7 = pnand %p3133_p6, %p3127_p3 }
  0x10   :  { %3137 = shalt.err (!%p3134_p7)
}
  0x11   :  { %s3211_s28 = smov 256   ;;  %s3212_s29 = smov 16  }
  0x12   :  { %34 = dma.hbm_to_vmem [thread:$0]  %s3303_s1, 32768, %s29_s19, [#allocation6], %s3211_s28, %s3211_s28, %s3212_s29  }
  0x13   :  { %s3213_s7 = smov [#allocation2]   ;;  %s3214_s9 = smov [#allocation7]  }
  0x14   :  { %s19_s8 = sshll.u32 %s3213_s7, 4  ;;  %s42_s10 = sshll.u32 %s3214_s9, 4  ;;  %s20_s8 = int_to_ptr.vmem [resolvable:$true] %s19_s8  ;;  %s43_s10 = int_to_ptr.vmem [resolvable:$true] %s42_s10 }
  0x15   :  { %s3138_s13 = scalar_lea.hbm %s3302_s0, 1024 }
  0x16   :  { %p3139_p8 = scmp.ne.s32.totalorder %s3302_s0, %s3138_s13  ;;  %p3142_p9 = scmp.lt.u32.totalorder %s3138_s13, %s3302_s0 }
  0x18   :  { %p3144_p10 = pnand %p3142_p9, %p3139_p8 }
  0x1a   :  { %3147 = shalt.err (!%p3144_p10)
}
  0x1b   :  { %s3148_s1 = scalar_lea.vmem %s20_s8, 1024  ;;  %p3153_p12 = scmp.lt.s32.totalorder %s20_s8, %s20_s8 }
  0x1c   :  { %p3149_p11 = scmp.ne.s32.totalorder %s20_s8, %s3148_s1  ;;  %p3154_p13 = scmp.lt.s32.totalorder %s3148_s1, %s3148_s1 }
  0x1e   :  { %p3155_p0 = por %p3154_p13, %p3153_p12 }
  0x20   :  { %p3156_p1 = pnand %p3155_p0, %p3149_p11 }
  0x22   :  { %3159 = shalt.err (!%p3156_p1)
}
  0x23   :  { %22 = dma.hbm_to_vmem [thread:$0]  %s3302_s0, 1024, %s20_s8, [#allocation3]  }
  0x24   :  { %s3160_s22 = scalar_lea.hbm %s3305_s3, 4096 }
  0x25   :  { %p3161_p2 = scmp.ne.s32.totalorder %s3305_s3, %s3160_s22  ;;  %p3164_p3 = scmp.lt.u32.totalorder %s3160_s22, %s3305_s3 }
  0x27   :  { %p3166_p4 = pnand %p3164_p3, %p3161_p2 }
  0x29   :  { %3169 = shalt.err (!%p3166_p4)
}
  0x2a   :  { %s3170_s27 = scalar_lea.vmem %s43_s10, 4096  ;;  %p3175_p6 = scmp.lt.s32.totalorder %s43_s10, %s43_s10 }
  0x2b   :  { %p3171_p5 = scmp.ne.s32.totalorder %s43_s10, %s3170_s27  ;;  %p3176_p7 = scmp.lt.s32.totalorder %s3170_s27, %s3170_s27 }
  0x2d   :  { %p3177_p8 = por %p3176_p7, %p3175_p6 }
  0x2f   :  { %p3178_p9 = pnand %p3177_p8, %p3171_p5 }
  0x31   :  { %3181 = shalt.err (!%p3178_p9)
}
  0x32   :  { %s3215_s0 = smov 64   ;;  %s3216_s28 = smov 4  }
  0x33   :  { %48 = dma.hbm_to_vmem [thread:$0]  %s3305_s3, 4096, %s43_s10, [#allocation6], %s3215_s0, %s3215_s0, %s3216_s28  }
  0x34   :  { %3204 = dma.done.wait [#allocation3], 1024  }
  0x35   :  { %3205 = vsyncadd [#allocation3], 4294966272 }
  0x36   :  { %3206 = dma.done.wait [#allocation6], 36864  }
  0x37   :  { %3207 = vsyncadd [#allocation6], 4294930432  ;;  %v2700_v0 = vld [vmem:[#allocation5 + $0x4] ss:$16 sps:$4 sm:$0xff]   ;;  %v2702_v1 = vld [vmem:[#allocation5 + $0xc] ss:$16 sps:$4 sm:$0xff]  }
  0x38   :  { %1635 = vmatprep.subr.bf16.mxu0 %v2700_v0  ;;  %v2704_v2 = vld [vmem:[#allocation5] ss:$16 sps:$4 sm:$0xff]   ;;  %v2705_v3 = vld [vmem:[#allocation5 + $0x8] ss:$16 sps:$4 sm:$0xff]   ;;  %1799 = vmatprep.subr.bf16.mxu1 %v2702_v1  ;;  %v2706_v4 = vld [vmem:[#allocation5 + $0x24] ss:$16 sps:$4 sm:$0xff]  }
  0x39   :  { %1636 = vmatpush1.bf16.msra.mxu0 %v2704_v2  ;;  %1800 = vmatpush1.bf16.msra.mxu1 %v2705_v3  ;;  %v2708_v5 = vld [vmem:[#allocation5 + $0x2c] ss:$16 sps:$4 sm:$0xff]   ;;  %v2710_v6 = vld [vmem:[#allocation5 + $0x20] ss:$16 sps:$4 sm:$0xff]   ;;  %v2711_v7 = vld [vmem:[#allocation5 + $0x28] ss:$16 sps:$4 sm:$0xff]  }
  0x3a   :  { %1637 = vmatprep.subr.bf16.mxu0 %v2706_v4  ;;  %1801 = vmatprep.subr.bf16.mxu1 %v2708_v5  ;;  %v2712_v8 = vld [vmem:[#allocation5 + $0x44] ss:$16 sps:$4 sm:$0xff]   ;;  %v2714_v9 = vld [vmem:[#allocation5 + $0x4c] ss:$16 sps:$4 sm:$0xff]   ;;  %v2716_v10 = vld [vmem:[#allocation5 + $0x40] ss:$16 sps:$4 sm:$0xff]  }
  0x3b   :  { %v2717_v11 = vld [vmem:[#allocation5 + $0x48] ss:$16 sps:$4 sm:$0xff]   ;;  %v2718_v12 = vld [vmem:[#allocation5 + $0x64] ss:$16 sps:$4 sm:$0xff]   ;;  %v2720_v13 = vld [vmem:[#allocation5 + $0x6c] ss:$16 sps:$4 sm:$0xff]  }
  0x3c   :  { %v2722_v14 = vld [vmem:[#allocation5 + $0x60] ss:$16 sps:$4 sm:$0xff]   ;;  %v2723_v15 = vld [vmem:[#allocation5 + $0x68] ss:$16 sps:$4 sm:$0xff]   ;;  %v2724_v16 = vld [vmem:[#allocation5 + $0x84] ss:$16 sps:$4 sm:$0xff]  }
  0x3d   :  { %1638 = vmatpush1.bf16.msra.mxu0 %v2710_v6  ;;  %1802 = vmatpush1.bf16.msra.mxu1 %v2711_v7  ;;  %v2726_v17 = vld [vmem:[#allocation5 + $0x8c] ss:$16 sps:$4 sm:$0xff]   ;;  %v2728_v18 = vld [vmem:[#allocation5 + $0x80] ss:$16 sps:$4 sm:$0xff]   ;;  %v2729_v19 = vld [vmem:[#allocation5 + $0x88] ss:$16 sps:$4 sm:$0xff]  }
  0x3e   :  { %1639 = vmatprep.subr.bf16.mxu0 %v2712_v8  ;;  %1803 = vmatprep.subr.bf16.mxu1 %v2714_v9  ;;  %v2730_v20 = vld [vmem:[#allocation5 + $0xa4] ss:$16 sps:$4 sm:$0xff]   ;;  %v2732_v21 = vld [vmem:[#allocation5 + $0xac] ss:$16 sps:$4 sm:$0xff]   ;;  %v2734_v22 = vld [vmem:[#allocation5 + $0xa0] ss:$16 sps:$4 sm:$0xff]  }
  0x3f   :  { %v2735_v23 = vld [vmem:[#allocation5 + $0xa8] ss:$16 sps:$4 sm:$0xff]   ;;  %v2736_v24 = vld [vmem:[#allocation5 + $0xc4] ss:$16 sps:$4 sm:$0xff]   ;;  %v2738_v25 = vld [vmem:[#allocation5 + $0xcc] ss:$16 sps:$4 sm:$0xff]  }
  0x40   :  { %v2740_v26 = vld [vmem:[#allocation5 + $0xc0] ss:$16 sps:$4 sm:$0xff]   ;;  %v2741_v27 = vld [vmem:[#allocation5 + $0xc8] ss:$16 sps:$4 sm:$0xff]   ;;  %v2742_v28 = vld [vmem:[#allocation5 + $0xe4] ss:$16 sps:$4 sm:$0xff]  }
  0x41   :  { %1640 = vmatpush1.bf16.msra.mxu0 %v2716_v10  ;;  %1804 = vmatpush1.bf16.msra.mxu1 %v2717_v11  ;;  %v2744_v29 = vld [vmem:[#allocation5 + $0xec] ss:$16 sps:$4 sm:$0xff]   ;;  %v2746_v30 = vld [vmem:[#allocation5 + $0xe0] ss:$16 sps:$4 sm:$0xff]   ;;  %v2747_v31 = vld [vmem:[#allocation5 + $0xe8] ss:$16 sps:$4 sm:$0xff]  }
  0x42   :  { %1641 = vmatprep.subr.bf16.mxu0 %v2718_v12  ;;  %1805 = vmatprep.subr.bf16.mxu1 %v2720_v13  ;;  %v2748_v32 = vld [vmem:[#allocation5 + $0x104] ss:$16 sps:$4 sm:$0xff]   ;;  %v2750_v33 = vld [vmem:[#allocation5 + $0x10c] ss:$16 sps:$4 sm:$0xff]   ;;  %v2752_v34 = vld [vmem:[#allocation5 + $0x100] ss:$16 sps:$4 sm:$0xff]  }
  0x43   :  { %v2753_v35 = vld [vmem:[#allocation5 + $0x108] ss:$16 sps:$4 sm:$0xff]   ;;  %v2754_v36 = vld [vmem:[#allocation5 + $0x124] ss:$16 sps:$4 sm:$0xff]   ;;  %v2756_v37 = vld [vmem:[#allocation5 + $0x12c] ss:$16 sps:$4 sm:$0xff]  }
  0x44   :  { %v2758_v38 = vld [vmem:[#allocation5 + $0x120] ss:$16 sps:$4 sm:$0xff]   ;;  %v2759_v39 = vld [vmem:[#allocation5 + $0x128] ss:$16 sps:$4 sm:$0xff]   ;;  %v2760_v40 = vld [vmem:[#allocation5 + $0x144] ss:$16 sps:$4 sm:$0xff]  }
  0x45   :  { %1642 = vmatpush1.bf16.msra.mxu0 %v2722_v14  ;;  %1806 = vmatpush1.bf16.msra.mxu1 %v2723_v15  ;;  %v2762_v41 = vld [vmem:[#allocation5 + $0x14c] ss:$16 sps:$4 sm:$0xff]   ;;  %v2764_v42 = vld [vmem:[#allocation5 + $0x140] ss:$16 sps:$4 sm:$0xff]   ;;  %v2765_v43 = vld [vmem:[#allocation5 + $0x148] ss:$16 sps:$4 sm:$0xff]  }
  0x46   :  { %1643 = vmatprep.subr.bf16.mxu0 %v2724_v16  ;;  %1807 = vmatprep.subr.bf16.mxu1 %v2726_v17  ;;  %v2766_v44 = vld [vmem:[#allocation5 + $0x164] ss:$16 sps:$4 sm:$0xff]   ;;  %v2768_v45 = vld [vmem:[#allocation5 + $0x16c] ss:$16 sps:$4 sm:$0xff]   ;;  %v2770_v47 = vld [vmem:[#allocation5 + $0x160] ss:$16 sps:$4 sm:$0xff]  }
  0x47   :  { %v62_v46 = vld [vmem:[#allocation2 + $0x8] sm:$0xff]  ;;  %v2772_v50 = vld [vmem:[#allocation5 + $0x184] ss:$16 sps:$4 sm:$0xff]   ;;  %v2776_v52 = vld [vmem:[#allocation5 + $0x180] ss:$16 sps:$4 sm:$0xff]   ;;  %s3217_s8 = smov [#allocation8]  }
  0x48   :  { %v70_v48 = vpack.c.bf16 %v62_v46, %v62_v46  ;;  %v2771_v49 = vld [vmem:[#allocation5 + $0x168] ss:$16 sps:$4 sm:$0xff]   ;;  %v2774_v51 = vld [vmem:[#allocation5 + $0x18c] ss:$16 sps:$4 sm:$0xff]   ;;  %v2778_v54 = vld [vmem:[#allocation5 + $0x1a4] ss:$16 sps:$4 sm:$0xff]  }
  0x49   :  { %1644 = vmatpush1.bf16.msra.mxu0 %v2728_v18  ;;  %1808 = vmatpush1.bf16.msra.mxu1 %v2729_v19  ;;  %v2777_v53 = vld [vmem:[#allocation5 + $0x188] ss:$16 sps:$4 sm:$0xff]   ;;  %v2780_v55 = vld [vmem:[#allocation5 + $0x1ac] ss:$16 sps:$4 sm:$0xff]   ;;  %v2782_v56 = vld [vmem:[#allocation5 + $0x1a0] ss:$16 sps:$4 sm:$0xff]  }
  0x4a   :  { %1645 = vmatprep.subr.bf16.mxu0 %v2730_v20  ;;  %1809 = vmatprep.subr.bf16.mxu1 %v2732_v21  ;;  %v2783_v57 = vld [vmem:[#allocation5 + $0x1a8] ss:$16 sps:$4 sm:$0xff]   ;;  %v2784_v58 = vld [vmem:[#allocation5 + $0x1c4] ss:$16 sps:$4 sm:$0xff]   ;;  %v2786_v59 = vld [vmem:[#allocation5 + $0x1cc] ss:$16 sps:$4 sm:$0xff]  }
  0x4b   :  { %1667 = vmatprep.mubr.bf16.mxu0 %v70_v48  ;;  %1831 = vmatprep.mubr.bf16.mxu1 %v70_v48  ;;  %v2788_v60 = vld [vmem:[#allocation5 + $0x1c0] ss:$16 sps:$4 sm:$0xff]   ;;  %v2789_v61 = vld [vmem:[#allocation5 + $0x1c8] ss:$16 sps:$4 sm:$0xff]   ;;  %v2790_v62 = vld [vmem:[#allocation5 + $0x1e4] ss:$16 sps:$4 sm:$0xff]  }
  0x4c   :  { %v2792_v63 = vld [vmem:[#allocation5 + $0x1ec] ss:$16 sps:$4 sm:$0xff]   ;;  %v2794_v0 = vld [vmem:[#allocation5 + $0x1e0] ss:$16 sps:$4 sm:$0xff]   ;;  %v2795_v1 = vld [vmem:[#allocation5 + $0x1e8] ss:$16 sps:$4 sm:$0xff]  }
  0x4d   :  { %1646 = vmatpush1.bf16.msra.mxu0 %v2734_v22  ;;  %1810 = vmatpush1.bf16.msra.mxu1 %v2735_v23  ;;  %v61_v2 = vld [vmem:[#allocation2] sm:$0xff]  ;;  %v2801_v4 = vld [vmem:[#allocation5 + $0x20c] ss:$16 sps:$4 sm:$0xff]   ;;  %v2799_v7 = vld [vmem:[#allocation5 + $0x208] ss:$16 sps:$4 sm:$0xff]   ;;  %s2321_s9 = sshll.u32 %s3217_s8, 4  ;;  %s2322_s9 = int_to_ptr.vmem [resolvable:$true] %s2321_s9 }
  0x4e   :  { %1647 = vmatprep.subr.bf16.mxu0 %v2736_v24  ;;  %1811 = vmatprep.subr.bf16.mxu1 %v2738_v25  ;;  %v2798_v3 = vld [vmem:[#allocation5 + $0x204] ss:$16 sps:$4 sm:$0xff]   ;;  %v69_v5 = vpack.c.bf16 %v61_v2, %v61_v2  ;;  %v2796_v6 = vld [vmem:[#allocation5 + $0x200] ss:$16 sps:$4 sm:$0xff]   ;;  %v2807_v9 = vld [vmem:[#allocation5 + $0x22c] ss:$16 sps:$4 sm:$0xff]   ;;  %p3187_p11 = scmp.lt.s32.totalorder %s2322_s9, %s2322_s9 }
  0x4f   :  { %v2804_v8 = vld [vmem:[#allocation5 + $0x224] ss:$16 sps:$4 sm:$0xff]   ;;  %v2802_v10 = vld [vmem:[#allocation5 + $0x220] ss:$16 sps:$4 sm:$0xff]   ;;  %v2805_v11 = vld [vmem:[#allocation5 + $0x228] ss:$16 sps:$4 sm:$0xff]  }
  0x50   :  { %v2810_v12 = vld [vmem:[#allocation5 + $0x244] ss:$16 sps:$4 sm:$0xff]   ;;  %v2813_v13 = vld [vmem:[#allocation5 + $0x24c] ss:$16 sps:$4 sm:$0xff]   ;;  %v2808_v14 = vld [vmem:[#allocation5 + $0x240] ss:$16 sps:$4 sm:$0xff]  }
  0x51   :  { %1648 = vmatpush1.bf16.msra.mxu0 %v2740_v26  ;;  %1812 = vmatpush1.bf16.msra.mxu1 %v2741_v27  ;;  %v2811_v15 = vld [vmem:[#allocation5 + $0x248] ss:$16 sps:$4 sm:$0xff]   ;;  %v2816_v16 = vld [vmem:[#allocation5 + $0x264] ss:$16 sps:$4 sm:$0xff]   ;;  %v2819_v17 = vld [vmem:[#allocation5 + $0x26c] ss:$16 sps:$4 sm:$0xff]  }
  0x52   :  { %1649 = vmatprep.subr.bf16.mxu0 %v2742_v28  ;;  %1813 = vmatprep.subr.bf16.mxu1 %v2744_v29  ;;  %v2814_v18 = vld [vmem:[#allocation5 + $0x260] ss:$16 sps:$4 sm:$0xff]   ;;  %v2817_v19 = vld [vmem:[#allocation5 + $0x268] ss:$16 sps:$4 sm:$0xff]   ;;  %v2822_v20 = vld [vmem:[#allocation5 + $0x284] ss:$16 sps:$4 sm:$0xff]  }
  0x53   :  { %v2825_v21 = vld [vmem:[#allocation5 + $0x28c] ss:$16 sps:$4 sm:$0xff]   ;;  %v2820_v22 = vld [vmem:[#allocation5 + $0x280] ss:$16 sps:$4 sm:$0xff]   ;;  %v2823_v23 = vld [vmem:[#allocation5 + $0x288] ss:$16 sps:$4 sm:$0xff]  }
  0x54   :  { %v2828_v24 = vld [vmem:[#allocation5 + $0x2a4] ss:$16 sps:$4 sm:$0xff]   ;;  %v2831_v25 = vld [vmem:[#allocation5 + $0x2ac] ss:$16 sps:$4 sm:$0xff]   ;;  %v2826_v26 = vld [vmem:[#allocation5 + $0x2a0] ss:$16 sps:$4 sm:$0xff]  }
  0x55   :  { %1650 = vmatpush1.bf16.msra.mxu0 %v2746_v30  ;;  %1814 = vmatpush1.bf16.msra.mxu1 %v2747_v31  ;;  %v2829_v27 = vld [vmem:[#allocation5 + $0x2a8] ss:$16 sps:$4 sm:$0xff]   ;;  %v2834_v28 = vld [vmem:[#allocation5 + $0x2c4] ss:$16 sps:$4 sm:$0xff]   ;;  %v2837_v29 = vld [vmem:[#allocation5 + $0x2cc] ss:$16 sps:$4 sm:$0xff]  }
  0x56   :  { %1651 = vmatprep.subr.bf16.mxu0 %v2748_v32  ;;  %1815 = vmatprep.subr.bf16.mxu1 %v2750_v33  ;;  %v64_v30 = vld [vmem:[#allocation2 + $0x18] sm:$0xff]  ;;  %v2832_v31 = vld [vmem:[#allocation5 + $0x2c0] ss:$16 sps:$4 sm:$0xff]   ;;  %v2858_v46 = vld [vmem:[#allocation5 + $0x344] ss:$16 sps:$4 sm:$0xff]   ;;  %s3182_s10 = scalar_lea.vmem %s2322_s9, 128 }
  0x57   :  { %v72_v32 = vpack.c.bf16 %v64_v30, %v64_v30  ;;  %v2835_v33 = vld [vmem:[#allocation5 + $0x2c8] ss:$16 sps:$4 sm:$0xff]   ;;  %v2856_v48 = vld [vmem:[#allocation5 + $0x340] ss:$16 sps:$4 sm:$0xff]   ;;  %v2888_v2 = vld [vmem:[#allocation5 + $0x3e4] ss:$16 sps:$4 sm:$0xff]   ;;  %p3183_p10 = scmp.ne.s32.totalorder %s2322_s9, %s3182_s10  ;;  %p3188_p12 = scmp.lt.s32.totalorder %s3182_s10, %s3182_s10 }
  0x58   :  { %v2924_v30 = vld [vmem:[#allocation5 + $0x4a4] ss:$16 sps:$4 sm:$0xff]  }
  0x59   :  { %1652 = vmatpush1.bf16.msra.mxu0 %v2752_v34  ;;  %1816 = vmatpush1.bf16.msra.mxu1 %v2753_v35  ;;  %v2840_v34 = vld [vmem:[#allocation5 + $0x2e4] ss:$16 sps:$4 sm:$0xff]   ;;  %v2843_v35 = vld [vmem:[#allocation5 + $0x2ec] ss:$16 sps:$4 sm:$0xff]   ;;  %p3189_p13 = por %p3188_p12, %p3187_p11 }
  0x5a   :  { %1653 = vmatprep.subr.bf16.mxu0 %v2754_v36  ;;  %1817 = vmatprep.subr.bf16.mxu1 %v2756_v37  ;;  %v2838_v36 = vld [vmem:[#allocation5 + $0x2e0] ss:$16 sps:$4 sm:$0xff]   ;;  %v2841_v37 = vld [vmem:[#allocation5 + $0x2e8] ss:$16 sps:$4 sm:$0xff]  }
  0x5b   :  { %p3190_p0 = pnand %p3189_p13, %p3183_p10 }
  0x5d   :  { %1654 = vmatpush1.bf16.msra.mxu0 %v2758_v38  ;;  %1818 = vmatpush1.bf16.msra.mxu1 %v2759_v39  ;;  %v2846_v38 = vld [vmem:[#allocation5 + $0x304] ss:$16 sps:$4 sm:$0xff]   ;;  %v2849_v39 = vld [vmem:[#allocation5 + $0x30c] ss:$16 sps:$4 sm:$0xff]  }
  0x5e   :  { %1655 = vmatprep.subr.bf16.mxu0 %v2760_v40  ;;  %1819 = vmatprep.subr.bf16.mxu1 %v2762_v41  ;;  %v2844_v40 = vld [vmem:[#allocation5 + $0x300] ss:$16 sps:$4 sm:$0xff]   ;;  %v2847_v41 = vld [vmem:[#allocation5 + $0x308] ss:$16 sps:$4 sm:$0xff]  }
  0x61   :  { %1656 = vmatpush1.bf16.msra.mxu0 %v2764_v42  ;;  %1820 = vmatpush1.bf16.msra.mxu1 %v2765_v43  ;;  %v2852_v42 = vld [vmem:[#allocation5 + $0x324] ss:$16 sps:$4 sm:$0xff]   ;;  %v2855_v43 = vld [vmem:[#allocation5 + $0x32c] ss:$16 sps:$4 sm:$0xff]  }
  0x62   :  { %1657 = vmatprep.subr.bf16.mxu0 %v2766_v44  ;;  %1821 = vmatprep.subr.bf16.mxu1 %v2768_v45  ;;  %v2850_v44 = vld [vmem:[#allocation5 + $0x320] ss:$16 sps:$4 sm:$0xff]   ;;  %v2853_v45 = vld [vmem:[#allocation5 + $0x328] ss:$16 sps:$4 sm:$0xff]  }
  0x65   :  { %1658 = vmatpush1.bf16.msra.mxu0 %v2770_v47  ;;  %1822 = vmatpush1.bf16.msra.mxu1 %v2771_v49  ;;  %v2861_v47 = vld [vmem:[#allocation5 + $0x34c] ss:$16 sps:$4 sm:$0xff]   ;;  %v2859_v49 = vld [vmem:[#allocation5 + $0x348] ss:$16 sps:$4 sm:$0xff]  }
  0x66   :  { %1659 = vmatprep.subr.bf16.mxu0 %v2772_v50  ;;  %1823 = vmatprep.subr.bf16.mxu1 %v2774_v51  ;;  %v2864_v50 = vld [vmem:[#allocation5 + $0x364] ss:$16 sps:$4 sm:$0xff]   ;;  %v2867_v51 = vld [vmem:[#allocation5 + $0x36c] ss:$16 sps:$4 sm:$0xff]  }
  0x69   :  { %1660 = vmatpush1.bf16.msra.mxu0 %v2776_v52  ;;  %1824 = vmatpush1.bf16.msra.mxu1 %v2777_v53  ;;  %v2862_v52 = vld [vmem:[#allocation5 + $0x360] ss:$16 sps:$4 sm:$0xff]   ;;  %v2865_v53 = vld [vmem:[#allocation5 + $0x368] ss:$16 sps:$4 sm:$0xff]  }
  0x6a   :  { %1661 = vmatprep.subr.bf16.mxu0 %v2778_v54  ;;  %1825 = vmatprep.subr.bf16.mxu1 %v2780_v55  ;;  %v2870_v54 = vld [vmem:[#allocation5 + $0x384] ss:$16 sps:$4 sm:$0xff]   ;;  %v2873_v55 = vld [vmem:[#allocation5 + $0x38c] ss:$16 sps:$4 sm:$0xff]  }
  0x6d   :  { %1662 = vmatpush1.bf16.msra.mxu0 %v2782_v56  ;;  %1826 = vmatpush1.bf16.msra.mxu1 %v2783_v57  ;;  %v2868_v56 = vld [vmem:[#allocation5 + $0x380] ss:$16 sps:$4 sm:$0xff]   ;;  %v2871_v57 = vld [vmem:[#allocation5 + $0x388] ss:$16 sps:$4 sm:$0xff]  }
  0x6e   :  { %1663 = vmatprep.subr.bf16.mxu0 %v2784_v58  ;;  %1827 = vmatprep.subr.bf16.mxu1 %v2786_v59  ;;  %v2876_v58 = vld [vmem:[#allocation5 + $0x3a4] ss:$16 sps:$4 sm:$0xff]   ;;  %v2879_v59 = vld [vmem:[#allocation5 + $0x3ac] ss:$16 sps:$4 sm:$0xff]  }
  0x71   :  { %1664 = vmatpush1.bf16.msra.mxu0 %v2788_v60  ;;  %1828 = vmatpush1.bf16.msra.mxu1 %v2789_v61  ;;  %v2874_v60 = vld [vmem:[#allocation5 + $0x3a0] ss:$16 sps:$4 sm:$0xff]   ;;  %v2877_v61 = vld [vmem:[#allocation5 + $0x3a8] ss:$16 sps:$4 sm:$0xff]  }
  0x72   :  { %1665 = vmatprep.subr.bf16.mxu0 %v2790_v62  ;;  %1829 = vmatprep.subr.bf16.mxu1 %v2792_v63  ;;  %v2882_v62 = vld [vmem:[#allocation5 + $0x3c4] ss:$16 sps:$4 sm:$0xff]   ;;  %v2885_v63 = vld [vmem:[#allocation5 + $0x3cc] ss:$16 sps:$4 sm:$0xff]  }
  0x75   :  { %1666 = vmatpush1.bf16.msra.mxu0 %v2794_v0  ;;  %1830 = vmatpush1.bf16.msra.mxu1 %v2795_v1  ;;  %v2880_v0 = vld [vmem:[#allocation5 + $0x3c0] ss:$16 sps:$4 sm:$0xff]   ;;  %v2883_v1 = vld [vmem:[#allocation5 + $0x3c8] ss:$16 sps:$4 sm:$0xff]  }
  0x76   :  { %1676 = vmatprep.subr.bf16.mxu0 %v2798_v3  ;;  %1840 = vmatprep.subr.bf16.mxu1 %v2801_v4  ;;  %v2891_v3 = vld [vmem:[#allocation5 + $0x3ec] ss:$16 sps:$4 sm:$0xff]   ;;  %v2886_v4 = vld [vmem:[#allocation5 + $0x3e0] ss:$16 sps:$4 sm:$0xff]  }
  0x78   :  { %1668 = vmatmul.mubr.bf16.vlgmr.msra.gmra.mrb[0].mxu0 %v69_v5  ;;  %1832 = vmatmul.mubr.bf16.vlgmr.msra.gmra.mrb[0].mxu1 %v69_v5  ;;  %v2889_v5 = vld [vmem:[#allocation5 + $0x3e8] ss:$16 sps:$4 sm:$0xff]  }
  0x79   :  { %1677 = vmatpush1.bf16.msra.mxu0 %v2796_v6  ;;  %1841 = vmatpush1.bf16.msra.mxu1 %v2799_v7  ;;  %v2894_v6 = vld [vmem:[#allocation5 + $0x404] ss:$16 sps:$4 sm:$0xff]  }
  0x7a   :  { %1678 = vmatprep.subr.bf16.mxu0 %v2804_v8  ;;  %1842 = vmatprep.subr.bf16.mxu1 %v2807_v9  ;;  %v63_v7 = vld [vmem:[#allocation2 + $0x10] sm:$0xff]  ;;  %v2897_v8 = vld [vmem:[#allocation5 + $0x40c] ss:$16 sps:$4 sm:$0xff]  }
  0x7b   :  { %1708 = vmatprep.mubr.bf16.mxu0 %v72_v32  ;;  %1872 = vmatprep.mubr.bf16.mxu1 %v72_v32  ;;  %v2892_v9 = vld [vmem:[#allocation5 + $0x400] ss:$16 sps:$4 sm:$0xff]  }
  0x7c   :  { %v2922_v32 = vld [vmem:[#allocation5 + $0x4a0] ss:$16 sps:$4 sm:$0xff]  }
  0x7d   :  { %1679 = vmatpush1.bf16.msra.mxu0 %v2802_v10  ;;  %1843 = vmatpush1.bf16.msra.mxu1 %v2805_v11  ;;  %v2895_v10 = vld [vmem:[#allocation5 + $0x408] ss:$16 sps:$4 sm:$0xff]   ;;  %v71_v11 = vpack.c.bf16 %v63_v7, %v63_v7  ;;  %v2987_v7 = vld [vmem:[#allocation5 + $0x5ec] ss:$16 sps:$4 sm:$0xff]  }
  0x7e   :  { %1680 = vmatprep.subr.bf16.mxu0 %v2810_v12  ;;  %1844 = vmatprep.subr.bf16.mxu1 %v2813_v13  ;;  %v2900_v12 = vld [vmem:[#allocation5 + $0x424] ss:$16 sps:$4 sm:$0xff]   ;;  %v2903_v13 = vld [vmem:[#allocation5 + $0x42c] ss:$16 sps:$4 sm:$0xff]  }
  0x81   :  { %1681 = vmatpush1.bf16.msra.mxu0 %v2808_v14  ;;  %1845 = vmatpush1.bf16.msra.mxu1 %v2811_v15  ;;  %v66_v14 = vld [vmem:[#allocation2 + $0x28] sm:$0xff] }
  0x82   :  { %1682 = vmatprep.subr.bf16.mxu0 %v2816_v16  ;;  %1846 = vmatprep.subr.bf16.mxu1 %v2819_v17  ;;  %v74_v15 = vpack.c.bf16 %v66_v14, %v66_v14  ;;  %v2898_v16 = vld [vmem:[#allocation5 + $0x420] ss:$16 sps:$4 sm:$0xff]   ;;  %v2901_v17 = vld [vmem:[#allocation5 + $0x428] ss:$16 sps:$4 sm:$0xff]  }
  0x83   :  { %v2991_v14 = vld [vmem:[#allocation5 + $0x608] ss:$16 sps:$4 sm:$0xff]  }
  0x85   :  { %1683 = vmatpush1.bf16.msra.mxu0 %v2814_v18  ;;  %1847 = vmatpush1.bf16.msra.mxu1 %v2817_v19  ;;  %v2906_v18 = vld [vmem:[#allocation5 + $0x444] ss:$16 sps:$4 sm:$0xff]   ;;  %v2909_v19 = vld [vmem:[#allocation5 + $0x44c] ss:$16 sps:$4 sm:$0xff]  }
  0x86   :  { %1684 = vmatprep.subr.bf16.mxu0 %v2822_v20  ;;  %1848 = vmatprep.subr.bf16.mxu1 %v2825_v21  ;;  %v2904_v20 = vld [vmem:[#allocation5 + $0x440] ss:$16 sps:$4 sm:$0xff]   ;;  %v2907_v21 = vld [vmem:[#allocation5 + $0x448] ss:$16 sps:$4 sm:$0xff]  }
  0x89   :  { %1685 = vmatpush1.bf16.msra.mxu0 %v2820_v22  ;;  %1849 = vmatpush1.bf16.msra.mxu1 %v2823_v23  ;;  %v2912_v22 = vld [vmem:[#allocation5 + $0x464] ss:$16 sps:$4 sm:$0xff]   ;;  %v2915_v23 = vld [vmem:[#allocation5 + $0x46c] ss:$16 sps:$4 sm:$0xff]  }
  0x8a   :  { %1686 = vmatprep.subr.bf16.mxu0 %v2828_v24  ;;  %1850 = vmatprep.subr.bf16.mxu1 %v2831_v25  ;;  %v2910_v24 = vld [vmem:[#allocation5 + $0x460] ss:$16 sps:$4 sm:$0xff]   ;;  %v2913_v25 = vld [vmem:[#allocation5 + $0x468] ss:$16 sps:$4 sm:$0xff]  }
  0x8d   :  { %1687 = vmatpush1.bf16.msra.mxu0 %v2826_v26  ;;  %1851 = vmatpush1.bf16.msra.mxu1 %v2829_v27  ;;  %v2918_v26 = vld [vmem:[#allocation5 + $0x484] ss:$16 sps:$4 sm:$0xff]   ;;  %v2921_v27 = vld [vmem:[#allocation5 + $0x48c] ss:$16 sps:$4 sm:$0xff]  }
  0x8e   :  { %1688 = vmatprep.subr.bf16.mxu0 %v2834_v28  ;;  %1852 = vmatprep.subr.bf16.mxu1 %v2837_v29  ;;  %v2916_v28 = vld [vmem:[#allocation5 + $0x480] ss:$16 sps:$4 sm:$0xff]   ;;  %v2919_v29 = vld [vmem:[#allocation5 + $0x488] ss:$16 sps:$4 sm:$0xff]  }
  0x91   :  { %1689 = vmatpush1.bf16.msra.mxu0 %v2832_v31  ;;  %1853 = vmatpush1.bf16.msra.mxu1 %v2835_v33  ;;  %v2927_v31 = vld [vmem:[#allocation5 + $0x4ac] ss:$16 sps:$4 sm:$0xff]   ;;  %v2925_v33 = vld [vmem:[#allocation5 + $0x4a8] ss:$16 sps:$4 sm:$0xff]  }
  0x92   :  { %1690 = vmatprep.subr.bf16.mxu0 %v2840_v34  ;;  %1854 = vmatprep.subr.bf16.mxu1 %v2843_v35  ;;  %v2930_v34 = vld [vmem:[#allocation5 + $0x4c4] ss:$16 sps:$4 sm:$0xff]   ;;  %v2933_v35 = vld [vmem:[#allocation5 + $0x4cc] ss:$16 sps:$4 sm:$0xff]  }
  0x95   :  { %1691 = vmatpush1.bf16.msra.mxu0 %v2838_v36  ;;  %1855 = vmatpush1.bf16.msra.mxu1 %v2841_v37  ;;  %v2928_v36 = vld [vmem:[#allocation5 + $0x4c0] ss:$16 sps:$4 sm:$0xff]   ;;  %v2931_v37 = vld [vmem:[#allocation5 + $0x4c8] ss:$16 sps:$4 sm:$0xff]  }
  0x96   :  { %1692 = vmatprep.subr.bf16.mxu0 %v2846_v38  ;;  %1856 = vmatprep.subr.bf16.mxu1 %v2849_v39  ;;  %v2936_v38 = vld [vmem:[#allocation5 + $0x4e4] ss:$16 sps:$4 sm:$0xff]   ;;  %v2939_v39 = vld [vmem:[#allocation5 + $0x4ec] ss:$16 sps:$4 sm:$0xff]  }
  0x99   :  { %1693 = vmatpush1.bf16.msra.mxu0 %v2844_v40  ;;  %1857 = vmatpush1.bf16.msra.mxu1 %v2847_v41  ;;  %v2934_v40 = vld [vmem:[#allocation5 + $0x4e0] ss:$16 sps:$4 sm:$0xff]   ;;  %v2937_v41 = vld [vmem:[#allocation5 + $0x4e8] ss:$16 sps:$4 sm:$0xff]  }
  0x9a   :  { %1694 = vmatprep.subr.bf16.mxu0 %v2852_v42  ;;  %1858 = vmatprep.subr.bf16.mxu1 %v2855_v43  ;;  %v2942_v42 = vld [vmem:[#allocation5 + $0x504] ss:$16 sps:$4 sm:$0xff]   ;;  %v2945_v43 = vld [vmem:[#allocation5 + $0x50c] ss:$16 sps:$4 sm:$0xff]  }
  0x9d   :  { %1695 = vmatpush1.bf16.msra.mxu0 %v2850_v44  ;;  %1859 = vmatpush1.bf16.msra.mxu1 %v2853_v45  ;;  %v2940_v44 = vld [vmem:[#allocation5 + $0x500] ss:$16 sps:$4 sm:$0xff]   ;;  %v2943_v45 = vld [vmem:[#allocation5 + $0x508] ss:$16 sps:$4 sm:$0xff]  }
  0x9e   :  { %1696 = vmatprep.subr.bf16.mxu0 %v2858_v46  ;;  %1860 = vmatprep.subr.bf16.mxu1 %v2861_v47  ;;  %v2948_v46 = vld [vmem:[#allocation5 + $0x524] ss:$16 sps:$4 sm:$0xff]   ;;  %v2951_v47 = vld [vmem:[#allocation5 + $0x52c] ss:$16 sps:$4 sm:$0xff]  }
  0xa1   :  { %1697 = vmatpush1.bf16.msra.mxu0 %v2856_v48  ;;  %1861 = vmatpush1.bf16.msra.mxu1 %v2859_v49  ;;  %v2946_v48 = vld [vmem:[#allocation5 + $0x520] ss:$16 sps:$4 sm:$0xff]   ;;  %v2949_v49 = vld [vmem:[#allocation5 + $0x528] ss:$16 sps:$4 sm:$0xff]  }
  0xa2   :  { %1698 = vmatprep.subr.bf16.mxu0 %v2864_v50  ;;  %1862 = vmatprep.subr.bf16.mxu1 %v2867_v51  ;;  %v2954_v50 = vld [vmem:[#allocation5 + $0x544] ss:$16 sps:$4 sm:$0xff]   ;;  %v2957_v51 = vld [vmem:[#allocation5 + $0x54c] ss:$16 sps:$4 sm:$0xff]  }
  0xa5   :  { %1699 = vmatpush1.bf16.msra.mxu0 %v2862_v52  ;;  %1863 = vmatpush1.bf16.msra.mxu1 %v2865_v53  ;;  %v2952_v52 = vld [vmem:[#allocation5 + $0x540] ss:$16 sps:$4 sm:$0xff]   ;;  %v2955_v53 = vld [vmem:[#allocation5 + $0x548] ss:$16 sps:$4 sm:$0xff]  }
  0xa6   :  { %1700 = vmatprep.subr.bf16.mxu0 %v2870_v54  ;;  %1864 = vmatprep.subr.bf16.mxu1 %v2873_v55  ;;  %v2960_v54 = vld [vmem:[#allocation5 + $0x564] ss:$16 sps:$4 sm:$0xff]   ;;  %v2963_v55 = vld [vmem:[#allocation5 + $0x56c] ss:$16 sps:$4 sm:$0xff]  }
  0xa9   :  { %1701 = vmatpush1.bf16.msra.mxu0 %v2868_v56  ;;  %1865 = vmatpush1.bf16.msra.mxu1 %v2871_v57  ;;  %v2958_v56 = vld [vmem:[#allocation5 + $0x560] ss:$16 sps:$4 sm:$0xff]   ;;  %v2961_v57 = vld [vmem:[#allocation5 + $0x568] ss:$16 sps:$4 sm:$0xff]  }
  0xaa   :  { %1702 = vmatprep.subr.bf16.mxu0 %v2876_v58  ;;  %1866 = vmatprep.subr.bf16.mxu1 %v2879_v59  ;;  %v2966_v58 = vld [vmem:[#allocation5 + $0x584] ss:$16 sps:$4 sm:$0xff]   ;;  %v2969_v59 = vld [vmem:[#allocation5 + $0x58c] ss:$16 sps:$4 sm:$0xff]  }
  0xad   :  { %1703 = vmatpush1.bf16.msra.mxu0 %v2874_v60  ;;  %1867 = vmatpush1.bf16.msra.mxu1 %v2877_v61  ;;  %v2964_v60 = vld [vmem:[#allocation5 + $0x580] ss:$16 sps:$4 sm:$0xff]   ;;  %v2967_v61 = vld [vmem:[#allocation5 + $0x588] ss:$16 sps:$4 sm:$0xff]  }
  0xae   :  { %1704 = vmatprep.subr.bf16.mxu0 %v2882_v62  ;;  %1868 = vmatprep.subr.bf16.mxu1 %v2885_v63  ;;  %v2972_v62 = vld [vmem:[#allocation5 + $0x5a4] ss:$16 sps:$4 sm:$0xff]   ;;  %v2975_v63 = vld [vmem:[#allocation5 + $0x5ac] ss:$16 sps:$4 sm:$0xff]  }
  0xb1   :  { %1705 = vmatpush1.bf16.msra.mxu0 %v2880_v0  ;;  %1869 = vmatpush1.bf16.msra.mxu1 %v2883_v1  ;;  %v2970_v0 = vld [vmem:[#allocation5 + $0x5a0] ss:$16 sps:$4 sm:$0xff]   ;;  %v2973_v1 = vld [vmem:[#allocation5 + $0x5a8] ss:$16 sps:$4 sm:$0xff]  }
  0xb2   :  { %1706 = vmatprep.subr.bf16.mxu0 %v2888_v2  ;;  %1870 = vmatprep.subr.bf16.mxu1 %v2891_v3  ;;  %v2978_v2 = vld [vmem:[#allocation5 + $0x5c4] ss:$16 sps:$4 sm:$0xff]   ;;  %v2981_v3 = vld [vmem:[#allocation5 + $0x5cc] ss:$16 sps:$4 sm:$0xff]  }
  0xb5   :  { %1707 = vmatpush1.bf16.msra.mxu0 %v2886_v4  ;;  %1871 = vmatpush1.bf16.msra.mxu1 %v2889_v5  ;;  %v2976_v4 = vld [vmem:[#allocation5 + $0x5c0] ss:$16 sps:$4 sm:$0xff]   ;;  %v2979_v5 = vld [vmem:[#allocation5 + $0x5c8] ss:$16 sps:$4 sm:$0xff]  }
  0xb6   :  { %1717 = vmatprep.subr.bf16.mxu0 %v2894_v6  ;;  %1881 = vmatprep.subr.bf16.mxu1 %v2897_v8  ;;  %v2984_v6 = vld [vmem:[#allocation5 + $0x5e4] ss:$16 sps:$4 sm:$0xff]   ;;  %v2982_v8 = vld [vmem:[#allocation5 + $0x5e0] ss:$16 sps:$4 sm:$0xff]  }
  0xb8   :  { %1709 = vmatmul.mubr.bf16.vlgmr.msra.gmra.mrb[0].mxu0 %v71_v11  ;;  %1873 = vmatmul.mubr.bf16.vlgmr.msra.gmra.mrb[0].mxu1 %v71_v11  ;;  %v65_v11 = vld [vmem:[#allocation2 + $0x20] sm:$0xff] }
  0xb9   :  { %1718 = vmatpush1.bf16.msra.mxu0 %v2892_v9  ;;  %1882 = vmatpush1.bf16.msra.mxu1 %v2895_v10  ;;  %v2985_v9 = vld [vmem:[#allocation5 + $0x5e8] ss:$16 sps:$4 sm:$0xff]   ;;  %v2990_v10 = vld [vmem:[#allocation5 + $0x604] ss:$16 sps:$4 sm:$0xff]  }
  0xba   :  { %1719 = vmatprep.subr.bf16.mxu0 %v2900_v12  ;;  %1883 = vmatprep.subr.bf16.mxu1 %v2903_v13  ;;  %v2993_v12 = vld [vmem:[#allocation5 + $0x60c] ss:$16 sps:$4 sm:$0xff]   ;;  %v2988_v13 = vld [vmem:[#allocation5 + $0x600] ss:$16 sps:$4 sm:$0xff]  }
  0xbb   :  { %1749 = vmatprep.mubr.bf16.mxu0 %v74_v15  ;;  %1913 = vmatprep.mubr.bf16.mxu1 %v74_v15  ;;  %v73_v15 = vpack.c.bf16 %v65_v11, %v65_v11  ;;  %v3083_v11 = vld [vmem:[#allocation5 + $0x7ec] ss:$16 sps:$4 sm:$0xff]  }
  0xbd   :  { %1720 = vmatpush1.bf16.msra.mxu0 %v2898_v16  ;;  %1884 = vmatpush1.bf16.msra.mxu1 %v2901_v17  ;;  %v68_v16 = vld [vmem:[#allocation2 + $0x38] sm:$0xff]  ;;  %v2996_v17 = vld [vmem:[#allocation5 + $0x624] ss:$16 sps:$4 sm:$0xff]  }
  0xbe   :  { %1721 = vmatprep.subr.bf16.mxu0 %v2906_v18  ;;  %1885 = vmatprep.subr.bf16.mxu1 %v2909_v19  ;;  %v2999_v18 = vld [vmem:[#allocation5 + $0x62c] ss:$16 sps:$4 sm:$0xff]   ;;  %v76_v19 = vpack.c.bf16 %v68_v16, %v68_v16  ;;  %v3085_v16 = vld [vmem:[#allocation7 + $0xc0] sm:$0xff]  }
  0xc1   :  { %1722 = vmatpush1.bf16.msra.mxu0 %v2904_v20  ;;  %1886 = vmatpush1.bf16.msra.mxu1 %v2907_v21  ;;  %v2994_v20 = vld [vmem:[#allocation5 + $0x620] ss:$16 sps:$4 sm:$0xff]   ;;  %v2997_v21 = vld [vmem:[#allocation5 + $0x628] ss:$16 sps:$4 sm:$0xff]  }
  0xc2   :  { %1723 = vmatprep.subr.bf16.mxu0 %v2912_v22  ;;  %1887 = vmatprep.subr.bf16.mxu1 %v2915_v23  ;;  %v3002_v22 = vld [vmem:[#allocation5 + $0x644] ss:$16 sps:$4 sm:$0xff]   ;;  %v3005_v23 = vld [vmem:[#allocation5 + $0x64c] ss:$16 sps:$4 sm:$0xff]  }
  0xc5   :  { %1724 = vmatpush1.bf16.msra.mxu0 %v2910_v24  ;;  %1888 = vmatpush1.bf16.msra.mxu1 %v2913_v25  ;;  %v3000_v24 = vld [vmem:[#allocation5 + $0x640] ss:$16 sps:$4 sm:$0xff]   ;;  %v3003_v25 = vld [vmem:[#allocation5 + $0x648] ss:$16 sps:$4 sm:$0xff]  }
  0xc6   :  { %1725 = vmatprep.subr.bf16.mxu0 %v2918_v26  ;;  %1889 = vmatprep.subr.bf16.mxu1 %v2921_v27  ;;  %v3008_v26 = vld [vmem:[#allocation5 + $0x664] ss:$16 sps:$4 sm:$0xff]   ;;  %v3011_v27 = vld [vmem:[#allocation5 + $0x66c] ss:$16 sps:$4 sm:$0xff]  }
  0xc9   :  { %1726 = vmatpush1.bf16.msra.mxu0 %v2916_v28  ;;  %1890 = vmatpush1.bf16.msra.mxu1 %v2919_v29  ;;  %v3006_v28 = vld [vmem:[#allocation5 + $0x660] ss:$16 sps:$4 sm:$0xff]   ;;  %v3009_v29 = vld [vmem:[#allocation5 + $0x668] ss:$16 sps:$4 sm:$0xff]  }
  0xca   :  { %1727 = vmatprep.subr.bf16.mxu0 %v2924_v30  ;;  %1891 = vmatprep.subr.bf16.mxu1 %v2927_v31  ;;  %v3014_v30 = vld [vmem:[#allocation5 + $0x684] ss:$16 sps:$4 sm:$0xff]   ;;  %v3017_v31 = vld [vmem:[#allocation5 + $0x68c] ss:$16 sps:$4 sm:$0xff]  }
  0xcd   :  { %1728 = vmatpush1.bf16.msra.mxu0 %v2922_v32  ;;  %1892 = vmatpush1.bf16.msra.mxu1 %v2925_v33  ;;  %v3012_v32 = vld [vmem:[#allocation5 + $0x680] ss:$16 sps:$4 sm:$0xff]   ;;  %v3015_v33 = vld [vmem:[#allocation5 + $0x688] ss:$16 sps:$4 sm:$0xff]  }
  0xce   :  { %1729 = vmatprep.subr.bf16.mxu0 %v2930_v34  ;;  %1893 = vmatprep.subr.bf16.mxu1 %v2933_v35  ;;  %v3020_v34 = vld [vmem:[#allocation5 + $0x6a4] ss:$16 sps:$4 sm:$0xff]   ;;  %v3023_v35 = vld [vmem:[#allocation5 + $0x6ac] ss:$16 sps:$4 sm:$0xff]  }
  0xd1   :  { %1730 = vmatpush1.bf16.msra.mxu0 %v2928_v36  ;;  %1894 = vmatpush1.bf16.msra.mxu1 %v2931_v37  ;;  %v3018_v36 = vld [vmem:[#allocation5 + $0x6a0] ss:$16 sps:$4 sm:$0xff]   ;;  %v3021_v37 = vld [vmem:[#allocation5 + $0x6a8] ss:$16 sps:$4 sm:$0xff]  }
  0xd2   :  { %1731 = vmatprep.subr.bf16.mxu0 %v2936_v38  ;;  %1895 = vmatprep.subr.bf16.mxu1 %v2939_v39  ;;  %v3026_v38 = vld [vmem:[#allocation5 + $0x6c4] ss:$16 sps:$4 sm:$0xff]   ;;  %v3029_v39 = vld [vmem:[#allocation5 + $0x6cc] ss:$16 sps:$4 sm:$0xff]  }
  0xd5   :  { %1732 = vmatpush1.bf16.msra.mxu0 %v2934_v40  ;;  %1896 = vmatpush1.bf16.msra.mxu1 %v2937_v41  ;;  %v3024_v40 = vld [vmem:[#allocation5 + $0x6c0] ss:$16 sps:$4 sm:$0xff]   ;;  %v3027_v41 = vld [vmem:[#allocation5 + $0x6c8] ss:$16 sps:$4 sm:$0xff]  }
  0xd6   :  { %1733 = vmatprep.subr.bf16.mxu0 %v2942_v42  ;;  %1897 = vmatprep.subr.bf16.mxu1 %v2945_v43  ;;  %v3032_v42 = vld [vmem:[#allocation5 + $0x6e4] ss:$16 sps:$4 sm:$0xff]   ;;  %v3035_v43 = vld [vmem:[#allocation5 + $0x6ec] ss:$16 sps:$4 sm:$0xff]  }
  0xd9   :  { %1734 = vmatpush1.bf16.msra.mxu0 %v2940_v44  ;;  %1898 = vmatpush1.bf16.msra.mxu1 %v2943_v45  ;;  %v3030_v44 = vld [vmem:[#allocation5 + $0x6e0] ss:$16 sps:$4 sm:$0xff]   ;;  %v3033_v45 = vld [vmem:[#allocation5 + $0x6e8] ss:$16 sps:$4 sm:$0xff]  }
  0xda   :  { %1735 = vmatprep.subr.bf16.mxu0 %v2948_v46  ;;  %1899 = vmatprep.subr.bf16.mxu1 %v2951_v47  ;;  %v3038_v46 = vld [vmem:[#allocation5 + $0x704] ss:$16 sps:$4 sm:$0xff]   ;;  %v3041_v47 = vld [vmem:[#allocation5 + $0x70c] ss:$16 sps:$4 sm:$0xff]  }
  0xdd   :  { %1736 = vmatpush1.bf16.msra.mxu0 %v2946_v48  ;;  %1900 = vmatpush1.bf16.msra.mxu1 %v2949_v49  ;;  %v3036_v48 = vld [vmem:[#allocation5 + $0x700] ss:$16 sps:$4 sm:$0xff]   ;;  %v3039_v49 = vld [vmem:[#allocation5 + $0x708] ss:$16 sps:$4 sm:$0xff]  }
  0xde   :  { %1737 = vmatprep.subr.bf16.mxu0 %v2954_v50  ;;  %1901 = vmatprep.subr.bf16.mxu1 %v2957_v51  ;;  %v3044_v50 = vld [vmem:[#allocation5 + $0x724] ss:$16 sps:$4 sm:$0xff]   ;;  %v3047_v51 = vld [vmem:[#allocation5 + $0x72c] ss:$16 sps:$4 sm:$0xff]  }
  0xe1   :  { %1738 = vmatpush1.bf16.msra.mxu0 %v2952_v52  ;;  %1902 = vmatpush1.bf16.msra.mxu1 %v2955_v53  ;;  %v3042_v52 = vld [vmem:[#allocation5 + $0x720] ss:$16 sps:$4 sm:$0xff]   ;;  %v3045_v53 = vld [vmem:[#allocation5 + $0x728] ss:$16 sps:$4 sm:$0xff]  }
  0xe2   :  { %1739 = vmatprep.subr.bf16.mxu0 %v2960_v54  ;;  %1903 = vmatprep.subr.bf16.mxu1 %v2963_v55  ;;  %v3050_v54 = vld [vmem:[#allocation5 + $0x744] ss:$16 sps:$4 sm:$0xff]   ;;  %v3053_v55 = vld [vmem:[#allocation5 + $0x74c] ss:$16 sps:$4 sm:$0xff]  }
  0xe5   :  { %1740 = vmatpush1.bf16.msra.mxu0 %v2958_v56  ;;  %1904 = vmatpush1.bf16.msra.mxu1 %v2961_v57  ;;  %v3048_v56 = vld [vmem:[#allocation5 + $0x740] ss:$16 sps:$4 sm:$0xff]   ;;  %v3051_v57 = vld [vmem:[#allocation5 + $0x748] ss:$16 sps:$4 sm:$0xff]  }
  0xe6   :  { %1741 = vmatprep.subr.bf16.mxu0 %v2966_v58  ;;  %1905 = vmatprep.subr.bf16.mxu1 %v2969_v59  ;;  %v3056_v58 = vld [vmem:[#allocation5 + $0x764] ss:$16 sps:$4 sm:$0xff]   ;;  %v3059_v59 = vld [vmem:[#allocation5 + $0x76c] ss:$16 sps:$4 sm:$0xff]  }
  0xe9   :  { %1742 = vmatpush1.bf16.msra.mxu0 %v2964_v60  ;;  %1906 = vmatpush1.bf16.msra.mxu1 %v2967_v61  ;;  %v3054_v60 = vld [vmem:[#allocation5 + $0x760] ss:$16 sps:$4 sm:$0xff]   ;;  %v3057_v61 = vld [vmem:[#allocation5 + $0x768] ss:$16 sps:$4 sm:$0xff]  }
  0xea   :  { %1743 = vmatprep.subr.bf16.mxu0 %v2972_v62  ;;  %1907 = vmatprep.subr.bf16.mxu1 %v2975_v63  ;;  %v3062_v62 = vld [vmem:[#allocation5 + $0x784] ss:$16 sps:$4 sm:$0xff]   ;;  %v3065_v63 = vld [vmem:[#allocation5 + $0x78c] ss:$16 sps:$4 sm:$0xff]  }
  0xed   :  { %1744 = vmatpush1.bf16.msra.mxu0 %v2970_v0  ;;  %1908 = vmatpush1.bf16.msra.mxu1 %v2973_v1  ;;  %v3060_v0 = vld [vmem:[#allocation5 + $0x780] ss:$16 sps:$4 sm:$0xff]   ;;  %v3063_v1 = vld [vmem:[#allocation5 + $0x788] ss:$16 sps:$4 sm:$0xff]  }
  0xee   :  { %1745 = vmatprep.subr.bf16.mxu0 %v2978_v2  ;;  %1909 = vmatprep.subr.bf16.mxu1 %v2981_v3  ;;  %v3068_v2 = vld [vmem:[#allocation5 + $0x7a4] ss:$16 sps:$4 sm:$0xff]   ;;  %v3071_v3 = vld [vmem:[#allocation5 + $0x7ac] ss:$16 sps:$4 sm:$0xff]  }
  0xf1   :  { %1746 = vmatpush1.bf16.msra.mxu0 %v2976_v4  ;;  %1910 = vmatpush1.bf16.msra.mxu1 %v2979_v5  ;;  %v3066_v4 = vld [vmem:[#allocation5 + $0x7a0] ss:$16 sps:$4 sm:$0xff]   ;;  %v3069_v5 = vld [vmem:[#allocation5 + $0x7a8] ss:$16 sps:$4 sm:$0xff]  }
  0xf2   :  { %1747 = vmatprep.subr.bf16.mxu0 %v2984_v6  ;;  %1911 = vmatprep.subr.bf16.mxu1 %v2987_v7  ;;  %v3074_v6 = vld [vmem:[#allocation5 + $0x7c4] ss:$16 sps:$4 sm:$0xff]   ;;  %v3077_v7 = vld [vmem:[#allocation5 + $0x7cc] ss:$16 sps:$4 sm:$0xff]  }
  0xf5   :  { %1748 = vmatpush1.bf16.msra.mxu0 %v2982_v8  ;;  %1912 = vmatpush1.bf16.msra.mxu1 %v2985_v9  ;;  %v3072_v8 = vld [vmem:[#allocation5 + $0x7c0] ss:$16 sps:$4 sm:$0xff]   ;;  %v3075_v9 = vld [vmem:[#allocation5 + $0x7c8] ss:$16 sps:$4 sm:$0xff]  }
  0xf6   :  { %1758 = vmatprep.subr.bf16.mxu0 %v2990_v10  ;;  %1922 = vmatprep.subr.bf16.mxu1 %v2993_v12  ;;  %v3080_v10 = vld [vmem:[#allocation5 + $0x7e4] ss:$16 sps:$4 sm:$0xff]   ;;  %v3078_v12 = vld [vmem:[#allocation5 + $0x7e0] ss:$16 sps:$4 sm:$0xff]  }
  0xf8   :  { %1750 = vmatmul.mubr.bf16.vlgmr.msra.gmra.mrb[0].mxu0 %v73_v15  ;;  %1914 = vmatmul.mubr.bf16.vlgmr.msra.gmra.mrb[0].mxu1 %v73_v15  ;;  %v3084_v15 = vld [vmem:[#allocation7 + $0x40] sm:$0xff]  }
  0xf9   :  { %1759 = vmatpush1.bf16.msra.mxu0 %v2988_v13  ;;  %1923 = vmatpush1.bf16.msra.mxu1 %v2991_v14  ;;  %v3081_v13 = vld [vmem:[#allocation5 + $0x7e8] ss:$16 sps:$4 sm:$0xff]   ;;  %v67_v14 = vld [vmem:[#allocation2 + $0x30] sm:$0xff] }
  0xfa   :  { %1760 = vmatprep.subr.bf16.mxu0 %v2996_v17  ;;  %1924 = vmatprep.subr.bf16.mxu1 %v2999_v18  ;;  %v75_v17 = vpack.c.bf16 %v67_v14, %v67_v14  ;;  %v3086_v18 = vld [vmem:[#allocation7] sm:$0xff]  }
  0xfb   :  { %1790 = vmatprep.mubr.bf16.mxu0 %v76_v19  ;;  %1954 = vmatprep.mubr.bf16.mxu1 %v76_v19  ;;  %v3087_v19 = vld [vmem:[#allocation7 + $0x80] sm:$0xff]  }
  0xfd   :  { %1761 = vmatpush1.bf16.msra.mxu0 %v2994_v20  ;;  %1925 = vmatpush1.bf16.msra.mxu1 %v2997_v21  ;;  %v3088_v20 = vld [vmem:[#allocation7 + $0x48] sm:$0xff]  }
  0xfe   :  { %1762 = vmatprep.subr.bf16.mxu0 %v3002_v22  ;;  %1926 = vmatprep.subr.bf16.mxu1 %v3005_v23  ;;  %v3089_v21 = vld [vmem:[#allocation7 + $0xc8] sm:$0xff]  }
  0xff   :  { %v3090_v22 = vld [vmem:[#allocation7 + $0x8] sm:$0xff]  }
 0x100   :  { %v3091_v23 = vld [vmem:[#allocation7 + $0x88] sm:$0xff]  }
 0x101   :  { %1763 = vmatpush1.bf16.msra.mxu0 %v3000_v24  ;;  %1927 = vmatpush1.bf16.msra.mxu1 %v3003_v25  ;;  %v3092_v24 = vld [vmem:[#allocation7 + $0x50] sm:$0xff]  }
 0x102   :  { %1764 = vmatprep.subr.bf16.mxu0 %v3008_v26  ;;  %1928 = vmatprep.subr.bf16.mxu1 %v3011_v27  ;;  %v3093_v25 = vld [vmem:[#allocation7 + $0xd0] sm:$0xff]  }
 0x103   :  { %v3094_v26 = vld [vmem:[#allocation7 + $0x10] sm:$0xff]  }
 0x104   :  { %v3095_v27 = vld [vmem:[#allocation7 + $0x90] sm:$0xff]  }
 0x105   :  { %1765 = vmatpush1.bf16.msra.mxu0 %v3006_v28  ;;  %1929 = vmatpush1.bf16.msra.mxu1 %v3009_v29  ;;  %v3096_v28 = vld [vmem:[#allocation7 + $0x58] sm:$0xff]  }
 0x106   :  { %1766 = vmatprep.subr.bf16.mxu0 %v3014_v30  ;;  %1930 = vmatprep.subr.bf16.mxu1 %v3017_v31  ;;  %v3097_v29 = vld [vmem:[#allocation7 + $0xd8] sm:$0xff]  }
 0x107   :  { %v3098_v30 = vld [vmem:[#allocation7 + $0x18] sm:$0xff]  }
 0x108   :  { %v3099_v31 = vld [vmem:[#allocation7 + $0x98] sm:$0xff]  }
 0x109   :  { %1767 = vmatpush1.bf16.msra.mxu0 %v3012_v32  ;;  %1931 = vmatpush1.bf16.msra.mxu1 %v3015_v33  ;;  %v3100_v32 = vld [vmem:[#allocation7 + $0x60] sm:$0xff]  }
 0x10a   :  { %1768 = vmatprep.subr.bf16.mxu0 %v3020_v34  ;;  %1932 = vmatprep.subr.bf16.mxu1 %v3023_v35  ;;  %v3101_v33 = vld [vmem:[#allocation7 + $0xe0] sm:$0xff]  }
 0x10b   :  { %v3102_v34 = vld [vmem:[#allocation7 + $0x20] sm:$0xff]  }
 0x10c   :  { %v3103_v35 = vld [vmem:[#allocation7 + $0xa0] sm:$0xff]  }
 0x10d   :  { %1769 = vmatpush1.bf16.msra.mxu0 %v3018_v36  ;;  %1933 = vmatpush1.bf16.msra.mxu1 %v3021_v37  ;;  %v3104_v36 = vld [vmem:[#allocation7 + $0x68] sm:$0xff]  }
 0x10e   :  { %1770 = vmatprep.subr.bf16.mxu0 %v3026_v38  ;;  %1934 = vmatprep.subr.bf16.mxu1 %v3029_v39  ;;  %v3105_v37 = vld [vmem:[#allocation7 + $0xe8] sm:$0xff]  }
 0x10f   :  { %v3106_v38 = vld [vmem:[#allocation7 + $0x28] sm:$0xff]  }
 0x110   :  { %v3107_v39 = vld [vmem:[#allocation7 + $0xa8] sm:$0xff]  }
 0x111   :  { %1771 = vmatpush1.bf16.msra.mxu0 %v3024_v40  ;;  %1935 = vmatpush1.bf16.msra.mxu1 %v3027_v41  ;;  %v3108_v40 = vld [vmem:[#allocation7 + $0x70] sm:$0xff]  }
 0x112   :  { %1772 = vmatprep.subr.bf16.mxu0 %v3032_v42  ;;  %1936 = vmatprep.subr.bf16.mxu1 %v3035_v43  ;;  %v3109_v41 = vld [vmem:[#allocation7 + $0xf0] sm:$0xff]  }
 0x113   :  { %v3110_v42 = vld [vmem:[#allocation7 + $0x30] sm:$0xff]  }
 0x114   :  { %v3111_v43 = vld [vmem:[#allocation7 + $0xb0] sm:$0xff]  }
 0x115   :  { %1773 = vmatpush1.bf16.msra.mxu0 %v3030_v44  ;;  %1937 = vmatpush1.bf16.msra.mxu1 %v3033_v45  ;;  %v3112_v44 = vld [vmem:[#allocation7 + $0x78] sm:$0xff]  }
 0x116   :  { %1774 = vmatprep.subr.bf16.mxu0 %v3038_v46  ;;  %1938 = vmatprep.subr.bf16.mxu1 %v3041_v47  ;;  %v3113_v45 = vld [vmem:[#allocation7 + $0xf8] sm:$0xff]  }
 0x117   :  { %v3114_v46 = vld [vmem:[#allocation7 + $0x38] sm:$0xff]  }
 0x118   :  { %v3115_v47 = vld [vmem:[#allocation7 + $0xb8] sm:$0xff]  }
 0x119   :  { %1775 = vmatpush1.bf16.msra.mxu0 %v3036_v48  ;;  %1939 = vmatpush1.bf16.msra.mxu1 %v3039_v49  ;;  %v335_v48 = vlaneseq }
 0x11a   :  { %1776 = vmatprep.subr.bf16.mxu0 %v3044_v50  ;;  %1940 = vmatprep.subr.bf16.mxu1 %v3047_v51 }
 0x11b   :  { %v336_v49 = vshrl.u32 %v335_v48, 7 }
 0x11d   :  { %1777 = vmatpush1.bf16.msra.mxu0 %v3042_v52  ;;  %1941 = vmatpush1.bf16.msra.mxu1 %v3045_v53  ;;  %v337_v50 = vsub.s32 0, %v336_v49  ;;  %v345_v51 = vsub.s32 2, %v336_v49  ;;  %v333_v52 = vld [vmem:[%s3304_s2] sm:$0xf]  ;;  %v341_v53 = vsub.s32 1, %v336_v49 }
 0x11e   :  { %1778 = vmatprep.subr.bf16.mxu0 %v3050_v54  ;;  %1942 = vmatprep.subr.bf16.mxu1 %v3053_v55  ;;  %v349_v54 = vsub.s32 3, %v336_v49 }
 0x11f   :  { %v338_v55 = vrot.slane %v333_v52, %v337_v50 }
 0x121   :  { %1779 = vmatpush1.bf16.msra.mxu0 %v3048_v56  ;;  %1943 = vmatpush1.bf16.msra.mxu1 %v3051_v57  ;;  %v346_v56 = vrot.slane %v333_v52, %v345_v51  ;;  %v342_v57 = vrot.slane %v333_v52, %v341_v53 }
 0x122   :  { %1780 = vmatprep.subr.bf16.mxu0 %v3056_v58  ;;  %1944 = vmatprep.subr.bf16.mxu1 %v3059_v59  ;;  %v350_v58 = vrot.slane %v333_v52, %v349_v54 }
 0x125   :  { %1781 = vmatpush1.bf16.msra.mxu0 %v3054_v60  ;;  %1945 = vmatpush1.bf16.msra.mxu1 %v3057_v61 }
 0x126   :  { %1782 = vmatprep.subr.bf16.mxu0 %v3062_v62  ;;  %1946 = vmatprep.subr.bf16.mxu1 %v3065_v63 }
 0x129   :  { %1783 = vmatpush1.bf16.msra.mxu0 %v3060_v0  ;;  %1947 = vmatpush1.bf16.msra.mxu1 %v3063_v1 }
 0x12a   :  { %1784 = vmatprep.subr.bf16.mxu0 %v3068_v2  ;;  %1948 = vmatprep.subr.bf16.mxu1 %v3071_v3 }
 0x12d   :  { %1785 = vmatpush1.bf16.msra.mxu0 %v3066_v4  ;;  %1949 = vmatpush1.bf16.msra.mxu1 %v3069_v5 }
 0x12e   :  { %1786 = vmatprep.subr.bf16.mxu0 %v3074_v6  ;;  %1950 = vmatprep.subr.bf16.mxu1 %v3077_v7 }
 0x131   :  { %1787 = vmatpush1.bf16.msra.mxu0 %v3072_v8  ;;  %1951 = vmatpush1.bf16.msra.mxu1 %v3075_v9 }
 0x132   :  { %1788 = vmatprep.subr.bf16.mxu0 %v3080_v10  ;;  %1952 = vmatprep.subr.bf16.mxu1 %v3083_v11 }
 0x135   :  { %1789 = vmatpush1.bf16.msra.mxu0 %v3078_v12  ;;  %1953 = vmatpush1.bf16.msra.mxu1 %v3081_v13 }
 0x136   :  { %2620 = vmatprep.subr.bf16.mxu0 %v3084_v15  ;;  %2642 = vmatprep.subr.bf16.mxu1 %v3085_v16 }
 0x138   :  { %1791 = vmatmul.mubr.bf16.vlgmr.msra.gmra.mrb[0].mxu0 %v75_v17  ;;  %1955 = vmatmul.mubr.bf16.vlgmr.msra.gmra.mrb[0].mxu1 %v75_v17  ;;  %v2587_v17 = vld [vmem:[%s3306_s4] ss:$0 sm:$0xff] }
 0x139   :  { %2621 = vmatpush3.bf16.msra.mxu0 %v3086_v18  ;;  %2643 = vmatpush3.bf16.msra.mxu1 %v3087_v19 }
 0x13a   :  { %2622 = vmatprep.subr.bf16.mxu0 %v3088_v20  ;;  %2644 = vmatprep.subr.bf16.mxu1 %v3089_v21 }
 0x13d   :  { %2623 = vmatpush3.bf16.msra.mxu0 %v3090_v22  ;;  %2645 = vmatpush3.bf16.msra.mxu1 %v3091_v23 }
 0x13e   :  { %2624 = vmatprep.subr.bf16.mxu0 %v3092_v24  ;;  %2646 = vmatprep.subr.bf16.mxu1 %v3093_v25 }
 0x141   :  { %2625 = vmatpush3.bf16.msra.mxu0 %v3094_v26  ;;  %2647 = vmatpush3.bf16.msra.mxu1 %v3095_v27 }
 0x142   :  { %2626 = vmatprep.subr.bf16.mxu0 %v3096_v28  ;;  %2648 = vmatprep.subr.bf16.mxu1 %v3097_v29 }
 0x145   :  { %2627 = vmatpush3.bf16.msra.mxu0 %v3098_v30  ;;  %2649 = vmatpush3.bf16.msra.mxu1 %v3099_v31 }
 0x146   :  { %2628 = vmatprep.subr.bf16.mxu0 %v3100_v32  ;;  %2650 = vmatprep.subr.bf16.mxu1 %v3101_v33 }
 0x149   :  { %2629 = vmatpush3.bf16.msra.mxu0 %v3102_v34  ;;  %2651 = vmatpush3.bf16.msra.mxu1 %v3103_v35 }
 0x14a   :  { %2630 = vmatprep.subr.bf16.mxu0 %v3104_v36  ;;  %2652 = vmatprep.subr.bf16.mxu1 %v3105_v37 }
 0x14d   :  { %2631 = vmatpush3.bf16.msra.mxu0 %v3106_v38  ;;  %2653 = vmatpush3.bf16.msra.mxu1 %v3107_v39 }
 0x14e   :  { %2632 = vmatprep.subr.bf16.mxu0 %v3108_v40  ;;  %2654 = vmatprep.subr.bf16.mxu1 %v3109_v41 }
 0x151   :  { %2633 = vmatpush3.bf16.msra.mxu0 %v3110_v42  ;;  %2655 = vmatpush3.bf16.msra.mxu1 %v3111_v43 }
 0x152   :  { %2634 = vmatprep.subr.bf16.mxu0 %v3112_v44  ;;  %2656 = vmatprep.subr.bf16.mxu1 %v3113_v45 }
 0x155   :  { %2635 = vmatpush3.bf16.msra.mxu0 %v3114_v46  ;;  %2657 = vmatpush3.bf16.msra.mxu1 %v3115_v47 }
 0x20b   :  { %v1792_v59 = vpop.f32.mrb[0].mxu0  ;;  %v1956_v60 = vpop.f32.mrb[0].mxu1 }
 0x20c   :  { %v2664_v61 = vadd.f32 %v1792_v59, %v338_v55  ;;  %v2666_v62 = vadd.f32 %v1956_v60, %v346_v56  ;;  %v1794_v63 = vpop.f32.mrb[1].mxu0  ;;  %v1958_v0 = vpop.f32.mrb[1].mxu1 }
 0x20d   :  { %v2665_v1 = vadd.f32 %v1794_v63, %v342_v57  ;;  %v2667_v2 = vadd.f32 %v1958_v0, %v350_v58  ;;  %v1796_v3 = vpop.f32.mrb[2].mxu0  ;;  %v1960_v4 = vpop.f32.mrb[2].mxu1 }
 0x20e   :  { %v1963_v5 = vmax.f32 %v2664_v61, 0.0  ;;  %v1965_v6 = vmax.f32 %v2666_v62, 0.0  ;;  %v1797_v7 = vpop.f32.mrb[3].mxu0  ;;  %v1961_v8 = vpop.f32.mrb[3].mxu1 }
 0x20f   :  { %v1964_v9 = vmax.f32 %v2665_v1, 0.0  ;;  %v1966_v10 = vmax.f32 %v2667_v2, 0.0 }
 0x210   :  { %v1967_v13 = vpack.c.bf16 %v1963_v5, %v1963_v5  ;;  %v1969_v14 = vpack.c.bf16 %v1965_v6, %v1965_v6 }
 0x211   :  { %v1968_v11 = vpack.c.bf16 %v1964_v9, %v1964_v9  ;;  %v1970_v12 = vpack.c.bf16 %v1966_v10, %v1966_v10 }
 0x213   :  { %2266 = vmatprep.mubr.bf16.mxu0 %v1968_v11  ;;  %2306 = vmatprep.mubr.bf16.mxu1 %v1970_v12 }
 0x214   :  { %2267 = vmatmul.mubr.bf16.vlgmr.msra.gmra.mrb[4].mxu0 %v1967_v13  ;;  %2307 = vmatmul.mubr.bf16.vlgmr.msra.gmra.mrb[4].mxu1 %v1969_v14 }
 0x2e7   :  { %v2636_v15 = vpop.f32.mrb[4].mxu0  ;;  %v2658_v16 = vpop.f32.mrb[4].mxu1 }
 0x2e8   :  { %v2637_v18 = vpop.f32.mrb[5].mxu0  ;;  %v2659_v19 = vpop.f32.mrb[5].mxu1 }
 0x2e9   :  { %v2638_v20 = vadd.f32 %v2637_v18, %v2636_v15  ;;  %v2660_v21 = vadd.f32 %v2659_v19, %v2658_v16  ;;  %v2639_v22 = vpop.f32.mrb[6].mxu0  ;;  %v2661_v23 = vpop.f32.mrb[6].mxu1 }
 0x2ea   :  { %v2640_v24 = vpop.f32.mrb[7].mxu0  ;;  %v2662_v25 = vpop.f32.mrb[7].mxu1 }
 0x2eb   :  { %v2269_v26 = vadd.f32 %v2638_v20, %v2587_v17 }
 0x2ed   :  { %v2309_v27 = vadd.f32 %v2660_v21, %v2269_v26 }
 0x2ef   :  { %2314 = vst [vmem:[#allocation8] sm:$0xff] %v2309_v27 }
 0x2f0   :  { %3193 = shalt.err (!%p3190_p0)
}
 0x2f1   :  { %s3194_s12 = scalar_lea.hbm %s3307_s5, 128 }
 0x2f2   :  { %p3195_p1 = scmp.ne.s32.totalorder %s3307_s5, %s3194_s12  ;;  %p3198_p2 = scmp.lt.u32.totalorder %s3194_s12, %s3307_s5 }
 0x2f4   :  { %p3200_p3 = pnand %p3198_p2, %p3195_p1 }
 0x2f6   :  { %3203 = shalt.err (!%p3200_p3)
}
 0x2f7   :  { %2324 = dma.vmem_to_hbm [thread:$0]  %s2322_s9, 128, %s3307_s5, [#allocation4]  }
 0x2f8   :  { %3208 = dma.done.wait [#allocation4], 128  }
 0x2f9   :  { %3209 = vsyncadd [#allocation4], 4294967168 }
 0x2fa   :  { %2328 = vsyncpa [#allocation3], 1 }
 0x2fb   :  { %2329 = vsyncpa [#allocation6], 1 }
 0x2fc   :  { %2330 = vsyncpa [#allocation4], 1 }

</bundles_post_ra>
